<compile_context>
chip_gen: v6e
topology: v6e:2x2x1
jax: 0.10.0
libtpu: 0.0.40
codegen_flags: <defaults>
</compile_context>

<pallas_src>
import functools

import jax
import jax.numpy as jnp
from jax.experimental import pallas as pl
from jax.experimental.pallas import tpu as pltpu


# --------------------------------------------------------------------------------------
# Kernel
# --------------------------------------------------------------------------------------
def _dim_reduce_kernel(x_ref, w_ref, b_ref, o_ref):
    # x_ref: (nb, C_in, t)   batch-block of spatial tiles; channels on sublanes, space on lanes
    # w_ref: (C_out, C_in)   1x1 conv weight with BN scale folded in (grid-invariant)
    # b_ref: (C_out, 1)      folded conv-bias + BN shift, f32 (grid-invariant)
    # o_ref: (nb, C_out, t)  NCHW-native output tiles (lane-dense stores)
    #
    # Note: for very small C_in/C_out a VPU broadcast-MAC would avoid MXU push/pop latency,
    # but the kernel is HBM-bandwidth-bound on every generation, so jnp.dot is kept.
    w = w_ref[...]
    b = b_ref[...]
    for n in range(x_ref.shape[0]):                                     # static unroll over nb
        y = jnp.dot(w, x_ref[n], preferred_element_type=jnp.float32)    # (C_out, t) on MXU
        o_ref[n] = jnp.maximum(y + b, 0.0).astype(o_ref.dtype)          # bias + ReLU on VPU


# --------------------------------------------------------------------------------------
# Tiling helpers (host-side, static)
# --------------------------------------------------------------------------------------
def _cdiv(a, b):
    return -(-a // b)


def _round_up(a, b):
    return _cdiv(a, b) * b


def _vmem_limit_bytes():
    """Generation-aware scoped-VMEM limit: ~half of physical (v5e/v6e 64 MiB, v7x 32 MiB)."""
    try:
        cap = int(pltpu.get_tpu_info().vmem_capacity_bytes)
    except Exception:
        cap = 64 * 1024 * 1024  # conservative fallback, safe on every generation
    return int(min(cap // 2, 100 * 1024 * 1024))


def _select_tiling(N, C_in, C_out, HW, itemsize, budget, max_tile_hw=None):
    """Pick (nb, t): batch block and lane-dense spatial tile sized from the VMEM budget."""
    sub = max(8, 32 // max(itemsize, 1))            # sublane packing granularity
    cin_p = _round_up(C_in, sub)
    cout_p = _round_up(C_out, sub)
    # Grid-invariant params; budget them as double-buffered (covers the fallback path too).
    fixed = 2 * cout_p * _round_up(C_in, 128) * itemsize + 2 * cout_p * 128 * 4
    per_lane = 2 * (cin_p + cout_p) * itemsize      # in + out, double-buffered, per lane column
    avail = max(budget - fixed, per_lane * 128)

    t = max(128, (avail // per_lane) // 128 * 128)  # largest lane-aligned tile that fits
    if max_tile_hw is not None:
        t = max(128, min(t, _round_up(int(max_tile_hw), 128)))
    if t >= HW:
        t = HW                                      # single full-dim spatial block (always legal)

    # Batch block: amortize the ~0.35 us per-step overhead when per-image traffic is small.
    per_img = per_lane * t
    target = 4 * 1024 * 1024
    nb = 1
    while nb < N and (nb + 1) * per_img + fixed <= budget and nb * per_img < target:
        nb += 1
    # Keep >= 2 grid steps when possible so both TensorCores (v7x megacore) get work.
    if N >= 2 and _cdiv(N, nb) * _cdiv(HW, t) < 2:
        nb = (N + 1) // 2
    return nb, t


# --------------------------------------------------------------------------------------
# Forward
# --------------------------------------------------------------------------------------
@functools.partial(jax.jit,
                   static_argnames=("nb", "t", "vmem_limit", "single_buffer_params"))
def _forward(x3d, w_oi, bias, gamma, beta, running_mean, running_var, eps,
             *, nb, t, vmem_limit, single_buffer_params):
    N, C_in, HW = x3d.shape
    C_out = w_oi.shape[0]

    # Fold inference BatchNorm into the 1x1 conv (tiny host-side glue, fused under jit).
    # TODO(synk): training-mode BatchNorm (batch statistics + running-stat update) is not
    # implemented; this kernel is the inference forward.
    scale = gamma / jnp.sqrt(running_var + eps)                                # (C_out,)
    w_folded = (w_oi * scale[:, None]).astype(x3d.dtype)                       # (C_out, C_in)
    b_folded = (bias * scale + beta - running_mean * scale).astype(jnp.float32)
    b_folded = b_folded.reshape(C_out, 1)

    if single_buffer_params:
        # Grid-invariant operands: a single VMEM buffer frees VMEM for larger spatial tiles.
        w_spec = pl.BlockSpec((C_out, C_in), lambda n, s: (0, 0),
                              pipeline_mode=pl.Buffered(1))
        b_spec = pl.BlockSpec((C_out, 1), lambda n, s: (0, 0),
                              pipeline_mode=pl.Buffered(1))
    else:
        w_spec = pl.BlockSpec((C_out, C_in), lambda n, s: (0, 0))
        b_spec = pl.BlockSpec((C_out, 1), lambda n, s: (0, 0))

    grid = (_cdiv(N, nb), _cdiv(HW, t))

    out3d = pl.pallas_call(
        _dim_reduce_kernel,
        out_shape=jax.ShapeDtypeStruct((N, C_out, HW), x3d.dtype),
        grid_spec=pltpu.PrefetchScalarGridSpec(
            num_scalar_prefetch=0,
            grid=grid,
            in_specs=[
                pl.BlockSpec((nb, C_in, t), lambda n, s: (n, 0, s)),
                w_spec,
                b_spec,
            ],
            out_specs=pl.BlockSpec((nb, C_out, t), lambda n, s: (n, 0, s)),
        ),
        compiler_params=pltpu.CompilerParams(
            dimension_semantics=("parallel", "parallel"),
            vmem_limit_bytes=int(vmem_limit),
        ),
    )(x3d, w_folded, b_folded)

    return out3d


def before_pooling_dim_reduce(x_nchw, w_oi, bias, gamma, beta, running_mean,
                              running_var, eps=1e-5, max_tile_hw=None):
    """(N, C_in, H, W) -> (N, C_out, H, W): 1x1 conv + inference BatchNorm + ReLU."""
    N, C_in, H, W = x_nchw.shape
    C_out = w_oi.shape[0]
    HW = H * W

    vmem_limit = _vmem_limit_bytes()
    nb, t = _select_tiling(N, C_in, C_out, HW, jnp.dtype(x_nchw.dtype).itemsize,
                           budget=int(0.75 * vmem_limit), max_tile_hw=max_tile_hw)

    x3d = x_nchw.reshape(N, C_in, HW)       # free view; stays NCHW-native (no pad, no transpose)

    kwargs = dict(nb=nb, t=t, vmem_limit=vmem_limit)
    try:
        out3d = _forward(x3d, w_oi, bias, gamma, beta, running_mean, running_var,
                         eps, single_buffer_params=True, **kwargs)
        jax.block_until_ready(out3d)        # surface any deferred compile/runtime error here
    except Exception:
        # Older Pallas versions may reject Buffered(1); fall back to default double-buffering.
        out3d = _forward(x3d, w_oi, bias, gamma, beta, running_mean, running_var,
                         eps, single_buffer_params=False, **kwargs)

    return out3d.reshape(N, C_out, H, W)    # free view; no slice needed (no padding was added)


# --------------------------------------------------------------------------------------
# Parameter init matching the PyTorch module's _init_params
# --------------------------------------------------------------------------------------
def init_params(key, input_dim, output_dim):
    # Conv2d 1x1: kaiming_normal_(fan_out, relu) -> std = sqrt(2 / fan_out), fan_out = output_dim
    std = (2.0 / output_dim) ** 0.5
    w_oi = std * jax.random.normal(key, (output_dim, input_dim), dtype=jnp.float32)
    bias = jnp.zeros((output_dim,), jnp.float32)
    # BatchNorm2d: weight=1, bias=0; default running stats mean=0, var=1
    gamma = jnp.ones((output_dim,), jnp.float32)
    beta = jnp.zeros((output_dim,), jnp.float32)
    running_mean = jnp.zeros((output_dim,), jnp.float32)
    running_var = jnp.ones((output_dim,), jnp.float32)
    return w_oi, bias, gamma, beta, running_mean, running_var


# --------------------------------------------------------------------------------------
# Demo / correctness checks
# --------------------------------------------------------------------------------------
if __name__ == "__main__":
    def ref_forward(x, params, eps=1e-5):
        w, b, gamma, beta, rm, rv = params
        y = jnp.einsum('nchw,oc->nohw', x.astype(jnp.float32), w) + b[None, :, None, None]
        y = (y - rm[None, :, None, None]) / jnp.sqrt(rv + eps)[None, :, None, None]
        y = y * gamma[None, :, None, None] + beta[None, :, None, None]
        return jnp.maximum(y, 0.0)

    key = jax.random.PRNGKey(0)
    k_x, k_w = jax.random.split(key)

    # --- Test 1: canonical small shape, f32 -------------------------------------------
    N, C_in, H, W, C_out = 2, 4, 16, 16, 8
    x = jax.random.normal(k_x, (N, C_in, H, W), dtype=jnp.float32)
    params = init_params(k_w, C_in, C_out)
    out = jax.block_until_ready(before_pooling_dim_reduce(x, *params))
    ref = ref_forward(x, params)
    assert out.shape == (N, C_out, H, W)
    assert jnp.allclose(out, ref, atol=1e-5, rtol=1e-5)

    # --- Test 2: odd shapes -> no-pad partial blocks on batch axis, full-dim tiles ----
    k_x2, k_w2 = jax.random.split(jax.random.PRNGKey(1))
    x2 = jax.random.normal(k_x2, (3, 5, 7, 9), dtype=jnp.float32)
    params2 = init_params(k_w2, 5, 6)
    out2 = jax.block_until_ready(before_pooling_dim_reduce(x2, *params2))
    assert out2.shape == (3, 6, 7, 9)
    assert jnp.allclose(out2, ref_forward(x2, params2), atol=1e-5, rtol=1e-5)

    # --- Test 3: small forced tile -> partial (masked) spatial tail block -------------
    x3 = jax.random.normal(jax.random.PRNGKey(2), (2, 4, 10, 31), dtype=jnp.float32)
    out3 = jax.block_until_ready(before_pooling_dim_reduce(x3, *params, max_tile_hw=128))
    assert out3.shape == (2, 8, 10, 31)
    assert jnp.allclose(out3, ref_forward(x3, params), atol=1e-5, rtol=1e-5)

    # --- Test 4: bf16 I/O (halved HBM traffic; MXU still accumulates in f32) ----------
    out_bf16 = jax.block_until_ready(before_pooling_dim_reduce(x.astype(jnp.bfloat16), *params))
    assert out_bf16.dtype == jnp.bfloat16
    assert jnp.allclose(out_bf16.astype(jnp.float32), ref, atol=7.5e-2, rtol=5e-2)

    print("KERNEL_OK")
</pallas_src>

<mosaic_0001>
module attributes {stable_mosaic.version = 11 : i64} {
  func.func @_dim_reduce_kernel(%arg0: i32, %arg1: i32, %arg2: memref<1x4x256xf32, #tpu.memory_space<vmem>>, %arg3: memref<8x4xf32, #tpu.memory_space<vmem>>, %arg4: memref<8x1xf32, #tpu.memory_space<vmem>>, %arg5: memref<1x8x256xf32, #tpu.memory_space<vmem>>) attributes {dimension_semantics = [#tpu.dimension_semantics<parallel>, #tpu.dimension_semantics<parallel>], iteration_bounds = array<i64: 2, 1>, scalar_prefetch = 0 : i64, scratch_operands = 0 : i64, tpu.core_type = #tpu.core_type<tc>, window_params = [{transform_indices = @transform_0, window_bounds = array<i64: 1, 4, 256>}, {pipeline_mode = #tpu.pipeline_mode<synchronous>, transform_indices = @transform_1, window_bounds = array<i64: 8, 4>}, {pipeline_mode = #tpu.pipeline_mode<synchronous>, transform_indices = @transform_2, window_bounds = array<i64: 8, 1>}, {transform_indices = @transform_3, window_bounds = array<i64: 1, 8, 256>}]} {
    %c0 = arith.constant 0 : index
    %c0_0 = arith.constant 0 : index
    %0 = vector.load %arg3[%c0, %c0_0] : memref<8x4xf32, #tpu.memory_space<vmem>>, vector<8x4xf32>
    %c0_1 = arith.constant 0 : index
    %c0_2 = arith.constant 0 : index
    %1 = vector.load %arg4[%c0_1, %c0_2] : memref<8x1xf32, #tpu.memory_space<vmem>>, vector<8x1xf32>
    %c0_3 = arith.constant 0 : index
    %c0_4 = arith.constant 0 : index
    %c0_5 = arith.constant 0 : index
    %2 = vector.load %arg2[%c0_3, %c0_4, %c0_5] : memref<1x4x256xf32, #tpu.memory_space<vmem>>, vector<1x4x256xf32>
    %3 = vector.shape_cast %2 : vector<1x4x256xf32> to vector<4x256xf32>
    %cst = arith.constant dense<0.000000e+00> : vector<8x256xf32>
    %4 = tpu.matmul %0, %3, %cst {dimension_numbers = #tpu.dot_dimension_numbers<[1], [0], [0], [1], [0, 0, 1, 1], [], []>} : vector<8x4xf32>, vector<4x256xf32>, vector<8x256xf32> -> vector<8x256xf32>
    %5 = vector.broadcast %1 : vector<8x1xf32> to vector<8x256xf32>
    %6 = arith.addf %4, %5 : vector<8x256xf32>
    %cst_6 = arith.constant 0.000000e+00 : f32
    %7 = vector.broadcast %cst_6 : f32 to vector<8x256xf32>
    %8 = arith.maximumf %6, %7 : vector<8x256xf32>
    %c0_7 = arith.constant 0 : index
    %c0_8 = arith.constant 0 : index
    %c0_9 = arith.constant 0 : index
    %9 = vector.load %arg5[%c0_7, %c0_8, %c0_9] : memref<1x8x256xf32, #tpu.memory_space<vmem>>, vector<1x8x256xf32>
    %10 = vector.shape_cast %9 : vector<1x8x256xf32> to vector<8x256xf32>
    %11 = vector.shape_cast %8 : vector<8x256xf32> to vector<1x8x256xf32>
    tpu.vector_store %arg5[%c0_7, %c0_8, %c0_9], %11 {strides = array<i32>} : memref<1x8x256xf32, #tpu.memory_space<vmem>>, vector<1x8x256xf32>,
    return
  }
  func.func @transform_0(%arg0: i32, %arg1: i32) -> (i32, i32, i32) {
    %c0_i32 = arith.constant 0 : i32
    %c0_i32_0 = arith.constant 0 : i32
    return %arg0, %c0_i32, %arg1 : i32, i32, i32
  }
  func.func @transform_1(%arg0: i32, %arg1: i32) -> (i32, i32) {
    %c0_i32 = arith.constant 0 : i32
    %c0_i32_0 = arith.constant 0 : i32
    %c0_i32_1 = arith.constant 0 : i32
    return %c0_i32, %c0_i32_0 : i32, i32
  }
  func.func @transform_2(%arg0: i32, %arg1: i32) -> (i32, i32) {
    %c0_i32 = arith.constant 0 : i32
    %c0_i32_0 = arith.constant 0 : i32
    %c0_i32_1 = arith.constant 0 : i32
    return %c0_i32, %c0_i32_0 : i32, i32
  }
  func.func @transform_3(%arg0: i32, %arg1: i32) -> (i32, i32, i32) {
    %c0_i32 = arith.constant 0 : i32
    %c0_i32_0 = arith.constant 0 : i32
    return %arg0, %c0_i32, %arg1 : i32, i32, i32
  }
}

module attributes {stable_mosaic.version = 11 : i64} {
  func.func @_dim_reduce_kernel(%arg0: i32, %arg1: i32, %arg2: memref<1x4x256xf32, #tpu.memory_space<vmem>>, %arg3: memref<8x4xf32, #tpu.memory_space<vmem>>, %arg4: memref<8x1xf32, #tpu.memory_space<vmem>>, %arg5: memref<1x8x256xf32, #tpu.memory_space<vmem>>) attributes {dimension_semantics = [#tpu.dimension_semantics<parallel>, #tpu.dimension_semantics<parallel>], iteration_bounds = array<i64: 2, 1>, scalar_prefetch = 0 : i64, scratch_operands = 0 : i64, tpu.core_type = #tpu.core_type<tc>, window_params = [{transform_indices = @transform_0, window_bounds = array<i64: 1, 4, 256>}, {pipeline_mode = #tpu.pipeline_mode<synchronous>, transform_indices = @transform_1, window_bounds = array<i64: 8, 4>}, {pipeline_mode = #tpu.pipeline_mode<synchronous>, transform_indices = @transform_2, window_bounds = array<i64: 8, 1>}, {transform_indices = @transform_3, window_bounds = array<i64: 1, 8, 256>}]} {
    %c0 = arith.constant 0 : index
    %c0_0 = arith.constant 0 : index
    %0 = vector.load %arg3[%c0, %c0_0] : memref<8x4xf32, #tpu.memory_space<vmem>>, vector<8x4xf32>
    %c0_1 = arith.constant 0 : index
    %c0_2 = arith.constant 0 : index
    %1 = vector.load %arg4[%c0_1, %c0_2] : memref<8x1xf32, #tpu.memory_space<vmem>>, vector<8x1xf32>
    %c0_3 = arith.constant 0 : index
    %c0_4 = arith.constant 0 : index
    %c0_5 = arith.constant 0 : index
    %2 = vector.load %arg2[%c0_3, %c0_4, %c0_5] : memref<1x4x256xf32, #tpu.memory_space<vmem>>, vector<1x4x256xf32>
    %3 = vector.shape_cast %2 : vector<1x4x256xf32> to vector<4x256xf32>
    %cst = arith.constant dense<0.000000e+00> : vector<8x256xf32>
    %4 = tpu.matmul %0, %3, %cst {dimension_numbers = #tpu.dot_dimension_numbers<[1], [0], [0], [1], [0, 0, 1, 1], [], []>} : vector<8x4xf32>, vector<4x256xf32>, vector<8x256xf32> -> vector<8x256xf32>
    %5 = vector.broadcast %1 : vector<8x1xf32> to vector<8x256xf32>
    %6 = arith.addf %4, %5 : vector<8x256xf32>
    %cst_6 = arith.constant 0.000000e+00 : f32
    %7 = vector.broadcast %cst_6 : f32 to vector<8x256xf32>
    %8 = arith.maximumf %6, %7 : vector<8x256xf32>
    %c0_7 = arith.constant 0 : index
    %c0_8 = arith.constant 0 : index
    %c0_9 = arith.constant 0 : index
    %9 = vector.load %arg5[%c0_7, %c0_8, %c0_9] : memref<1x8x256xf32, #tpu.memory_space<vmem>>, vector<1x8x256xf32>
    %10 = vector.shape_cast %9 : vector<1x8x256xf32> to vector<8x256xf32>
    %11 = vector.shape_cast %8 : vector<8x256xf32> to vector<1x8x256xf32>
    tpu.vector_store %arg5[%c0_7, %c0_8, %c0_9], %11 {strides = array<i32>} : memref<1x8x256xf32, #tpu.memory_space<vmem>>, vector<1x8x256xf32>,
    return
  }
  func.func @transform_0(%arg0: i32, %arg1: i32) -> (i32, i32, i32) {
    %c0_i32 = arith.constant 0 : i32
    %c0_i32_0 = arith.constant 0 : i32
    return %arg0, %c0_i32, %arg1 : i32, i32, i32
  }
  func.func @transform_1(%arg0: i32, %arg1: i32) -> (i32, i32) {
    %c0_i32 = arith.constant 0 : i32
    %c0_i32_0 = arith.constant 0 : i32
    %c0_i32_1 = arith.constant 0 : i32
    return %c0_i32, %c0_i32_0 : i32, i32
  }
  func.func @transform_2(%arg0: i32, %arg1: i32) -> (i32, i32) {
    %c0_i32 = arith.constant 0 : i32
    %c0_i32_0 = arith.constant 0 : i32
    %c0_i32_1 = arith.constant 0 : i32
    return %c0_i32, %c0_i32_0 : i32, i32
  }
  func.func @transform_3(%arg0: i32, %arg1: i32) -> (i32, i32, i32) {
    %c0_i32 = arith.constant 0 : i32
    %c0_i32_0 = arith.constant 0 : i32
    return %arg0, %c0_i32, %arg1 : i32, i32, i32
  }
}

</mosaic_0001>

<bundles_post_ra>
// kernel: _forward.1
= control target key start
LH: loop header
LB: loop body
LE: loop exit
PB: predicated region body
PF: predicated region fallthrough
CT: control target
= control target key end

     0   :  { %8 = vsyncpa [#allocation3], 0  ;;  %s670_s0 = inlined_call_operand.vmem [shape: f32[2,4,256], index: 0, kind: input, shape index: {}]   ;;  %s671_s1 = inlined_call_operand.vmem [shape: f32[8,4], index: 1, kind: input, shape index: {}]   ;;  %s672_s2 = inlined_call_operand.vmem [shape: f32[8,1], index: 2, kind: input, shape index: {}]   ;;  %s673_s3 = inlined_call_operand.hbm [shape: f32[2,8,256], index: 3, kind: output, shape index: {}]  }
   0x1   :  { %10 = vsyncpa [#allocation3 + $0x1], 0  ;;  %s565_s12 = smov 0   ;;  %s567_s13 = smov 0  }
   0x2   :  { %s569_s14 = smov 0   ;;  %s571_s15 = smov 0  }
   0x3   :  { %s573_s16 = smov 0   ;;  %s575_s17 = smov 0  }
   0x4 LB: > { %s387_s18 = sadd.s32 4294967295, %s540_s17   ;;  %s388_s19 = sadd.s32 4294967294, %s540_s17   ;;  %s540_s17 = sphi %s575_s17, %s16_s17   ;;  %s536_s16 = sphi %s573_s16, %s680_s16   ;;  %s532_s15 = sphi %s571_s15, %s679_s15   ;;  %s528_s14 = sphi %s569_s14, %s678_s14   ;;  %s524_s13 = sphi %s567_s13, %s677_s13   ;;  %s520_s12 = sphi %s565_s12, %s676_s12  }
   0x5   : > { %s28_s20 = sadd.s32 1, %s536_s16  ;;  %s107_s21 = sadd.s32 1, %s528_s14 }
   0x6   : > { %p30_p0 = scmp.ge.s32.totalorder %s28_s20, 2  ;;  %p117_p1 = scmp.ne.s32.totalorder %s528_s14, %s524_s13 }
   0x7   : > { %p118_p2 = scmp.eq.s32.totalorder %s387_s18, 1  ;;  %p123_p3 = scmp.ne.s32.totalorder %s524_s13, %s520_s12 }
   0x8   : > { %s682_s20 = smov (%p30_p0, %s28_s20), 0  ;;  %p124_p5 = scmp.eq.s32.totalorder %s388_s19, 1 }
   0x9   : > { %p605_p4 = por %p118_p2, %p117_p1  ;;  %s102_s23 = ssub.s32 %s536_s16, %s682_s20 }
   0xa   : > { %p391_p6 = scmp.ge.s32.totalorder %s540_s17, 1  ;;  %p105_p7 = scmp.eq.s32.totalorder %s102_s23, 0 }
   0xb   : > { %p612_p8 = por %p124_p5, %p123_p3  ;;  %p161_p9 = scmp.lt.s32.totalorder %s540_s17, 3 }
   0xc   : > { %s618_s25 = scalar_select %p105_p7, %s528_s14, %s107_s21  }
   0xd   : > { %p162_p10 = pnand %p391_p6, %p161_p9 }
   0xe   : > { %p190_p11 = scmp.lt.s32.totalorder (!%p162_p10), %s532_s15, 1  ;;  %s186_s8 = sand.u32 (!%p162_p10), 1, %s524_s13  }
   0xf   : > { %165 = sbr.rel (%p162_p10) target bundleno = 241 (0xf1), region = 32  ;;  %s392_s9 = sshll.u32 (!%p162_p10), %s186_s8, 4 }
  0x10   : > { %s404_s10 = sshll.u32 (!%p162_p10), %s532_s15, 8  ;;  %s188_s11 = scalar_lea.vmem (!%p162_p10), [#allocation2], %s392_s9 }
  0x11   : > { %s311_s18 = sshll.u32 (!%p162_p10), %s188_s11, 4  ;;  %s309_s23 = scalar_lea.hbm (!%p162_p10), %s673_s3, %s404_s10  ;;  %s312_s18 = int_to_ptr.vmem [resolvable:$true] %s311_s18 }
  0x12   : > { %s295_s26 = scalar_lea.sflag (!%p162_p10), [#allocation3], %s186_s8  ;;  %s464_s27 = scalar_lea.vmem (!%p162_p10), %s312_s18, 256 }
  0x13   : > { %p465_p12 = scmp.ne.s32.totalorder (!%p162_p10), %s312_s18, %s464_s27 }
  0x14   : > { %v542_v0 = vmov 0.0   ;;  %v543_v1 = vmov 0   ;;  %v201_v2 = vld [vmem:[%s672_s2] sm:$0xff]  ;;  %s191_s28 = scalar_select %p190_p11, %s532_s15, 1  ;;  %vm214_vm0 = vcmask 1043456   ;;  %vm210_vm1 = vcmask 31744  }
  0x15   : > { %283 = vmatprep.mubr.f32.mxu0 %v542_v0  ;;  %462 = vset.pattern.permute.xlu0 %v543_v1  ;;  %v200_v5 = vld [vmem:[%s671_s1] sm:$0xff]  ;;  %p466_p13 = pnand %p465_p12, %p605_p4 }
  0x16   : > { %205 = vperm.xlu0 %462, %v201_v2   ;;  %s403_s29 = sshll.u32 %s191_s28, 3  ;;  %s544_s28 = smov [#allocation2]  }
  0x17   : > { %s197_s5 = scalar_lea.vmem %s670_s0, %s403_s29  ;;  %p467_p0 = pneg %p466_p13 }
  0x18   : > { %v202_v3 = vld [vmem:[%s197_s5] sm:$0xff]  ;;  %s468_s15 = sshll.u32 %s544_s28, 4  ;;  %s469_s15 = int_to_ptr.vmem [resolvable:$false] %s468_s15 }
  0x19   : > { %v209_v4 = vcombine.high %v202_v3, %v202_v3  ;;  %s470_s29 = scalar_lea.vmem %s469_s15, 512  ;;  %p471_p1 = scmp.lt.s32.totalorder %s312_s18, %s469_s15 }
  0x1a   : > { %p472_p2 = scmp.lt.s32.totalorder %s470_s29, %s464_s27 }
  0x1b   : > { %395 = vmatprep.subr.msk.mxu0 %vm214_vm0, %v209_v4 }
  0x1c   : > { %396 = vmatpush1.msk.msra.mxu0 %vm214_vm0, %v202_v3  ;;  %p473_p3 = por %p472_p2, %p471_p1 }
  0x1d   : > { %397 = vmatmul.mubr.msk.f32.vlgmr.msra.gmra.mxu0 %vm210_vm1, %v200_v5 }
  0x1e   : > { %p474_p5 = pnand %p473_p3, %p467_p0 }
  0x91   : > { %v206_v6 = vpop.permute.xlu0 %205 }
  0xdd   : > { %v285_v7 = vpop.f32.mrf.mxu0 }
  0xde   : > { %v286_v8 = vadd.f32 %v285_v7, %v206_v6 }
  0xdf   : > { %v287_v9 = vpop.f32.mrf.mxu0 }
  0xe0   : > { %v290_v10 = vmax.f32 %v286_v8, 0.0  ;;  %v288_v11 = vadd.f32 %v287_v9, %v206_v6 }
  0xe2   : > { %292 = vst [vmem:[%s188_s11] sm:$0xff] %v290_v10  ;;  %v291_v12 = vmax.f32 %v288_v11, 0.0 }
  0xe4   : > { %293 = vst [vmem:[%s188_s11 + $0x8] sm:$0xff] %v291_v12 }
  0xe5   : > { %477 = shalt.err (!%p474_p5)
}
  0xe6   : > { %s478_s30 = scalar_lea.hbm %s309_s23, 256  ;;  %s482_s6 = scalar_lea.hbm %s673_s3, 512 }
  0xe7   : > { %p479_p6 = scmp.ne.s32.totalorder %s309_s23, %s478_s30  ;;  %p483_p10 = scmp.lt.s32.totalorder %s309_s23, %s673_s3 }
  0xe8   : > { %p484_p11 = scmp.lt.s32.totalorder %s482_s6, %s478_s30 }
  0xe9   : > { %p480_p7 = pnand %p479_p6, %p605_p4 }
  0xea   : > { %p485_p12 = por %p484_p11, %p483_p10 }
  0xeb   : > { %p481_p9 = pneg %p480_p7 }
  0xed   : > { %p486_p13 = pnand %p485_p12, %p481_p9 }
  0xef   : > { %489 = shalt.err (!%p486_p13)
}
  0xf0   : > { %405 = dma.vmem_to_hbm [thread:$0]  (%p605_p4), %s312_s18, 256, %s309_s23, %s295_s26  }
  0xf1 PF: > { %p411_p0 = scmp.ge.s32.totalorder %s540_s17, 2  ;;  %s323_s9 = sand.u32 1, %s520_s12  }
  0xf2   : > { %s324_s10 = scalar_lea.sflag [#allocation3], %s323_s9 }
  0xf3   : > { %p408_p1 = pnand %p411_p0, %p612_p8 }
  0xf5   : > { %p409_p2 = pneg %p408_p1 }
  0xf7   : > { %515 = dma.done.wait (%p409_p2), %s324_s10, 256  }
  0xf8   : > { %517 = vsyncadd (%p409_p2), %s324_s10, 4294967040  ;;  %s16_s17 = sadd.s32 1, %s540_s17   ;;  %s676_s12 = smov %s524_s13 }
  0xf9   : > { %p13_p3 = scmp.ge.s32.totalorder %s16_s17, 4   ;;  %s677_s13 = smov %s528_s14 }
  0xfa   : > { %s678_s14 = smov %s618_s25  ;;  %s679_s15 = smov %s536_s16 }
  0xfb   : > { %s680_s16 = smov %s682_s20  ;;  %15 = sbr.rel (!%p13_p3) target bundleno = 4 (0x4), region = 67 }
 0x100   :  { %329 = vsyncpa [#allocation3], 1 }
 0x101   :  { %331 = vsyncpa [#allocation3 + $0x1], 1 }

// kernel: _forward.1
= control target key start
LH: loop header
LB: loop body
LE: loop exit
PB: predicated region body
PF: predicated region fallthrough
CT: control target
= control target key end

     0   :  { %8 = vsyncpa [#allocation3], 0  ;;  %s670_s0 = inlined_call_operand.vmem [shape: f32[2,4,256], index: 0, kind: input, shape index: {}]   ;;  %s671_s1 = inlined_call_operand.vmem [shape: f32[8,4], index: 1, kind: input, shape index: {}]   ;;  %s672_s2 = inlined_call_operand.vmem [shape: f32[8,1], index: 2, kind: input, shape index: {}]   ;;  %s673_s3 = inlined_call_operand.hbm [shape: f32[2,8,256], index: 3, kind: output, shape index: {}]  }
   0x1   :  { %10 = vsyncpa [#allocation3 + $0x1], 0  ;;  %s565_s12 = smov 0   ;;  %s567_s13 = smov 0  }
   0x2   :  { %s569_s14 = smov 0   ;;  %s571_s15 = smov 0  }
   0x3   :  { %s573_s16 = smov 0   ;;  %s575_s17 = smov 0  }
   0x4 LB: > { %s387_s18 = sadd.s32 4294967295, %s540_s17   ;;  %s388_s19 = sadd.s32 4294967294, %s540_s17   ;;  %s540_s17 = sphi %s575_s17, %s16_s17   ;;  %s536_s16 = sphi %s573_s16, %s680_s16   ;;  %s532_s15 = sphi %s571_s15, %s679_s15   ;;  %s528_s14 = sphi %s569_s14, %s678_s14   ;;  %s524_s13 = sphi %s567_s13, %s677_s13   ;;  %s520_s12 = sphi %s565_s12, %s676_s12  }
   0x5   : > { %s28_s20 = sadd.s32 1, %s536_s16  ;;  %s107_s21 = sadd.s32 1, %s528_s14 }
   0x6   : > { %p30_p0 = scmp.ge.s32.totalorder %s28_s20, 2  ;;  %p117_p1 = scmp.ne.s32.totalorder %s528_s14, %s524_s13 }
   0x7   : > { %p118_p2 = scmp.eq.s32.totalorder %s387_s18, 1  ;;  %p123_p3 = scmp.ne.s32.totalorder %s524_s13, %s520_s12 }
   0x8   : > { %s682_s20 = smov (%p30_p0, %s28_s20), 0  ;;  %p124_p5 = scmp.eq.s32.totalorder %s388_s19, 1 }
   0x9   : > { %p605_p4 = por %p118_p2, %p117_p1  ;;  %s102_s23 = ssub.s32 %s536_s16, %s682_s20 }
   0xa   : > { %p391_p6 = scmp.ge.s32.totalorder %s540_s17, 1  ;;  %p105_p7 = scmp.eq.s32.totalorder %s102_s23, 0 }
   0xb   : > { %p612_p8 = por %p124_p5, %p123_p3  ;;  %p161_p9 = scmp.lt.s32.totalorder %s540_s17, 3 }
   0xc   : > { %s618_s25 = scalar_select %p105_p7, %s528_s14, %s107_s21  }
   0xd   : > { %p162_p10 = pnand %p391_p6, %p161_p9 }
   0xe   : > { %p190_p11 = scmp.lt.s32.totalorder (!%p162_p10), %s532_s15, 1  ;;  %s186_s8 = sand.u32 (!%p162_p10), 1, %s524_s13  }
   0xf   : > { %165 = sbr.rel (%p162_p10) target bundleno = 241 (0xf1), region = 32  ;;  %s392_s9 = sshll.u32 (!%p162_p10), %s186_s8, 4 }
  0x10   : > { %s404_s10 = sshll.u32 (!%p162_p10), %s532_s15, 8  ;;  %s188_s11 = scalar_lea.vmem (!%p162_p10), [#allocation2], %s392_s9 }
  0x11   : > { %s311_s18 = sshll.u32 (!%p162_p10), %s188_s11, 4  ;;  %s309_s23 = scalar_lea.hbm (!%p162_p10), %s673_s3, %s404_s10  ;;  %s312_s18 = int_to_ptr.vmem [resolvable:$true] %s311_s18 }
  0x12   : > { %s295_s26 = scalar_lea.sflag (!%p162_p10), [#allocation3], %s186_s8  ;;  %s464_s27 = scalar_lea.vmem (!%p162_p10), %s312_s18, 256 }
  0x13   : > { %p465_p12 = scmp.ne.s32.totalorder (!%p162_p10), %s312_s18, %s464_s27 }
  0x14   : > { %v542_v0 = vmov 0.0   ;;  %v543_v1 = vmov 0   ;;  %v201_v2 = vld [vmem:[%s672_s2] sm:$0xff]  ;;  %s191_s28 = scalar_select %p190_p11, %s532_s15, 1  ;;  %vm214_vm0 = vcmask 1043456   ;;  %vm210_vm1 = vcmask 31744  }
  0x15   : > { %283 = vmatprep.mubr.f32.mxu0 %v542_v0  ;;  %462 = vset.pattern.permute.xlu0 %v543_v1  ;;  %v200_v5 = vld [vmem:[%s671_s1] sm:$0xff]  ;;  %p466_p13 = pnand %p465_p12, %p605_p4 }
  0x16   : > { %205 = vperm.xlu0 %462, %v201_v2   ;;  %s403_s29 = sshll.u32 %s191_s28, 3  ;;  %s544_s28 = smov [#allocation2]  }
  0x17   : > { %s197_s5 = scalar_lea.vmem %s670_s0, %s403_s29  ;;  %p467_p0 = pneg %p466_p13 }
  0x18   : > { %v202_v3 = vld [vmem:[%s197_s5] sm:$0xff]  ;;  %s468_s15 = sshll.u32 %s544_s28, 4  ;;  %s469_s15 = int_to_ptr.vmem [resolvable:$false] %s468_s15 }
  0x19   : > { %v209_v4 = vcombine.high %v202_v3, %v202_v3  ;;  %s470_s29 = scalar_lea.vmem %s469_s15, 512  ;;  %p471_p1 = scmp.lt.s32.totalorder %s312_s18, %s469_s15 }
  0x1a   : > { %p472_p2 = scmp.lt.s32.totalorder %s470_s29, %s464_s27 }
  0x1b   : > { %395 = vmatprep.subr.msk.mxu0 %vm214_vm0, %v209_v4 }
  0x1c   : > { %396 = vmatpush1.msk.msra.mxu0 %vm214_vm0, %v202_v3  ;;  %p473_p3 = por %p472_p2, %p471_p1 }
  0x1d   : > { %397 = vmatmul.mubr.msk.f32.vlgmr.msra.gmra.mxu0 %vm210_vm1, %v200_v5 }
  0x1e   : > { %p474_p5 = pnand %p473_p3, %p467_p0 }
  0x91   : > { %v206_v6 = vpop.permute.xlu0 %205 }
  0xdd   : > { %v285_v7 = vpop.f32.mrf.mxu0 }
  0xde   : > { %v286_v8 = vadd.f32 %v285_v7, %v206_v6 }
  0xdf   : > { %v287_v9 = vpop.f32.mrf.mxu0 }
  0xe0   : > { %v290_v10 = vmax.f32 %v286_v8, 0.0  ;;  %v288_v11 = vadd.f32 %v287_v9, %v206_v6 }
  0xe2   : > { %292 = vst [vmem:[%s188_s11] sm:$0xff] %v290_v10  ;;  %v291_v12 = vmax.f32 %v288_v11, 0.0 }
  0xe4   : > { %293 = vst [vmem:[%s188_s11 + $0x8] sm:$0xff] %v291_v12 }
  0xe5   : > { %477 = shalt.err (!%p474_p5)
}
  0xe6   : > { %s478_s30 = scalar_lea.hbm %s309_s23, 256  ;;  %s482_s6 = scalar_lea.hbm %s673_s3, 512 }
  0xe7   : > { %p479_p6 = scmp.ne.s32.totalorder %s309_s23, %s478_s30  ;;  %p483_p10 = scmp.lt.s32.totalorder %s309_s23, %s673_s3 }
  0xe8   : > { %p484_p11 = scmp.lt.s32.totalorder %s482_s6, %s478_s30 }
  0xe9   : > { %p480_p7 = pnand %p479_p6, %p605_p4 }
  0xea   : > { %p485_p12 = por %p484_p11, %p483_p10 }
  0xeb   : > { %p481_p9 = pneg %p480_p7 }
  0xed   : > { %p486_p13 = pnand %p485_p12, %p481_p9 }
  0xef   : > { %489 = shalt.err (!%p486_p13)
}
  0xf0   : > { %405 = dma.vmem_to_hbm [thread:$0]  (%p605_p4), %s312_s18, 256, %s309_s23, %s295_s26  }
  0xf1 PF: > { %p411_p0 = scmp.ge.s32.totalorder %s540_s17, 2  ;;  %s323_s9 = sand.u32 1, %s520_s12  }
  0xf2   : > { %s324_s10 = scalar_lea.sflag [#allocation3], %s323_s9 }
  0xf3   : > { %p408_p1 = pnand %p411_p0, %p612_p8 }
  0xf5   : > { %p409_p2 = pneg %p408_p1 }
  0xf7   : > { %515 = dma.done.wait (%p409_p2), %s324_s10, 256  }
  0xf8   : > { %517 = vsyncadd (%p409_p2), %s324_s10, 4294967040  ;;  %s16_s17 = sadd.s32 1, %s540_s17   ;;  %s676_s12 = smov %s524_s13 }
  0xf9   : > { %p13_p3 = scmp.ge.s32.totalorder %s16_s17, 4   ;;  %s677_s13 = smov %s528_s14 }
  0xfa   : > { %s678_s14 = smov %s618_s25  ;;  %s679_s15 = smov %s536_s16 }
  0xfb   : > { %s680_s16 = smov %s682_s20  ;;  %15 = sbr.rel (!%p13_p3) target bundleno = 4 (0x4), region = 67 }
 0x100   :  { %329 = vsyncpa [#allocation3], 1 }
 0x101   :  { %331 = vsyncpa [#allocation3 + $0x1], 1 }

</bundles_post_ra>
